<compile_context>
chip_gen: v7x
topology: tpu7x:2x2x1
jax: 0.10.0
libtpu: 0.0.40
codegen_flags: <defaults>
</compile_context>

<pallas_src>
import jax
import jax.numpy as jnp
import numpy as np
from jax.experimental import pallas as pl
from jax.experimental.pallas import tpu as pltpu

# ---------------- static config (consistent with Up.__init__ arithmetic) -------------------
B = 2
IN_CH = 8                        # in_channels
OUT_CH = 4                       # out_channels
HALF_CH = IN_CH // 2             # ConvTranspose1d output channels
LAYER_SIZES = (4, 8, 16)
LSTM_CH = max(LAYER_SIZES[1:])   # max_layer_size -> Glue1D in_channels = 16
LAYER_NUM = 0
SAMPLES_PER_BATCH = 64
LSTM_L = 8                       # lstm_out_sample_size

_first_up = SAMPLES_PER_BATCH
for _ in range(len(LAYER_SIZES) - 1):
    _first_up //= 2
IN_SAMPLE = _first_up * 2
for _ in range(LAYER_NUM):
    IN_SAMPLE *= 2
L_UP = IN_SAMPLE                 # = 32, length after transpose-conv / of down_output
L_X = L_UP // 2                  # = 16, input length of x

NL = B * L_UP                    # folded lane width (batch folded into lanes) = 64
NLX = B * L_X                    # folded lane width of x                     = 32
NLL = B * LSTM_L                 # folded lane width of lstm                  = 16


# --------------------------- packed parameter buffer layout --------------------------------
def _align8(n):
    return ((n + 7) // 8) * 8

OFF_E0 = 0                                 # (NLX, NL)   even-interleave scatter
OFF_E1 = OFF_E0 + _align8(NLX)             # (NLX, NL)   odd-interleave scatter
OFF_SP = OFF_E1 + _align8(NLX)             # (NL, NL)    shift col c-1 -> c (+ seam zeroing)
OFF_SM = OFF_SP + _align8(NL)              # (NL, NL)    shift col c+1 -> c (+ seam zeroing)
OFF_WL = OFF_SM + _align8(NL)              # (NLL, NL)   block-diag time Linear (W^T per batch)
OFF_HBIAS = OFF_WL + _align8(NLL)          # (IN_CH, NL) bl + bt(up rows) + bc*rowsum(wl)
OFF_WT = OFF_HBIAS + _align8(IN_CH)        # (2*IN_CH, IN_CH) zero-padded stacked transpose taps
OFF_WC = OFF_WT + _align8(2 * IN_CH)       # (IN_CH, LSTM_CH) Glue1D channel matcher
OFF_W1F = OFF_WC + _align8(IN_CH)          # (OUT_CH, 3*IN_CH) fused conv1 [W0|W1|W2]
OFF_B1P = OFF_W1F + _align8(OUT_CH)        # (OUT_CH, NL) conv1 bias plane
OFF_W2K0 = OFF_B1P + _align8(OUT_CH)       # (OUT_CH, OUT_CH) conv2 tap 0
OFF_W2K1 = OFF_W2K0 + _align8(OUT_CH)      # (OUT_CH, OUT_CH) conv2 tap 1
OFF_W2K2 = OFF_W2K1 + _align8(OUT_CH)      # (OUT_CH, OUT_CH) conv2 tap 2
OFF_B2P = OFF_W2K2 + _align8(OUT_CH)       # (OUT_CH, NL) conv2 bias plane
P_ROWS = OFF_B2P + _align8(OUT_CH)         # 288 rows x 64 lanes x f32 ~= 74 KiB


# ---------------------------------- Pallas kernel -------------------------------------------
def up_kernel(x_ref, down_ref, lstm_ref, p_ref, out_ref):
    f32 = jnp.float32
    x = x_ref[...]          # (IN_CH,  NLX)   batch folded into lanes
    down = down_ref[...]    # (IN_CH,  NL)    rows HALF_CH.. are zero (pre-padded)
    lstm = lstm_ref[...]    # (LSTM_CH, NLL)

    # ---- Glue1D: 1x1 channel conv then block-diagonal time Linear (biases in the plane) ----
    tmp = jnp.dot(p_ref[OFF_WC:OFF_WC + IN_CH, 0:LSTM_CH], lstm,
                  preferred_element_type=f32)                               # (IN_CH, NLL)
    glue = jnp.dot(tmp, p_ref[OFF_WL:OFF_WL + NLL, :],
                   preferred_element_type=f32)                              # (IN_CH, NL)

    # ---- ConvTranspose1d(k=2, s=2): stacked zero-padded weight matmul + even/odd interleave ----
    u = jnp.dot(p_ref[OFF_WT:OFF_WT + 2 * IN_CH, 0:IN_CH], x,
                preferred_element_type=f32)                                 # (2*IN_CH, NLX)
    up = (jnp.dot(u[:IN_CH, :], p_ref[OFF_E0:OFF_E0 + NLX, :],
                  preferred_element_type=f32)
          + jnp.dot(u[IN_CH:, :], p_ref[OFF_E1:OFF_E1 + NLX, :],
                    preferred_element_type=f32))                            # (IN_CH, NL), rows 0..HALF zero

    # diff = down.channels - up.channels == 0 for a valid Up -> nnF.pad is a no-op
    # (checked in the wrapper).  h = cat([down, up]) + lstm_norm as a pure VPU add chain.
    h = down + up + glue + p_ref[OFF_HBIAS:OFF_HBIAS + IN_CH, :]            # (IN_CH, NL)

    Sp = p_ref[OFF_SP:OFF_SP + NL, :]       # routes col c-1 -> c, zero across the batch seam
    Sm = p_ref[OFF_SM:OFF_SM + NL, :]       # routes col c+1 -> c, zero across the batch seam

    # ---- ConvBlock1D conv1 (k=3, p=1) + ReLU: tile-aligned (8+8+8 row) fused im2col ----
    hr = jnp.dot(h, Sp, preferred_element_type=f32)                         # input at l-1
    hl = jnp.dot(h, Sm, preferred_element_type=f32)                         # input at l+1
    im = jnp.concatenate([hr, h, hl], axis=0)                               # (3*IN_CH, NL)
    y1 = jnp.dot(p_ref[OFF_W1F:OFF_W1F + OUT_CH, 0:3 * IN_CH], im,
                 preferred_element_type=f32)
    y1 = jnp.maximum(y1 + p_ref[OFF_B1P:OFF_B1P + OUT_CH, :], 0.0)          # (OUT_CH, NL)

    # ---- ConvBlock1D conv2 + ReLU: split accumulating dots (no misaligned 4+4+4 concat) ----
    yr = jnp.dot(y1, Sp, preferred_element_type=f32)
    yl = jnp.dot(y1, Sm, preferred_element_type=f32)
    y2 = (jnp.dot(p_ref[OFF_W2K0:OFF_W2K0 + OUT_CH, 0:OUT_CH], yr,
                  preferred_element_type=f32)
          + jnp.dot(p_ref[OFF_W2K1:OFF_W2K1 + OUT_CH, 0:OUT_CH], y1,
                    preferred_element_type=f32)
          + jnp.dot(p_ref[OFF_W2K2:OFF_W2K2 + OUT_CH, 0:OUT_CH], yl,
                    preferred_element_type=f32))
    out_ref[...] = jnp.maximum(y2 + p_ref[OFF_B2P:OFF_B2P + OUT_CH, :],
                               0.0).astype(out_ref.dtype)


# ------------------------ host-side packing (ONE-TIME, model init) --------------------------
def pack_params(p):
    """Build the packed (P_ROWS, NL) f32 buffer once; reuse it for every forward call."""
    # Glue1D channel matcher (1x1 conv).
    wc = np.asarray(p["wc"][:, :, 0])                                  # (IN_CH, LSTM_CH)

    # ConvTranspose1d taps, stacked & zero-padded so the interleaved result lands in
    # rows HALF_CH..IN_CH of an (IN_CH, NL) array (no in-kernel concat with down).
    wt_pad = np.zeros((2 * IN_CH, IN_CH), np.float32)
    wt_pad[HALF_CH:IN_CH, :] = np.asarray(p["wt"][:, :, 0]).T          # tap 0
    wt_pad[IN_CH + HALF_CH:2 * IN_CH, :] = np.asarray(p["wt"][:, :, 1]).T  # tap 1

    # Glue1D time Linear, block-diagonal over the folded batch.
    wl = np.asarray(p["wl"])                                           # (L_UP, LSTM_L)
    wl_big = np.zeros((NLL, NL), np.float32)
    for b in range(B):
        wl_big[b * LSTM_L:(b + 1) * LSTM_L, b * L_UP:(b + 1) * L_UP] = wl.T

    # Bias plane for h: bl (tiled over batch) + bt on the up rows + bc routed through
    # the time Linear (bc[:,None] * rowsum(wl)); this also removes the lstm ones-row fold.
    bl_tiled = np.tile(np.asarray(p["bl"]), B)                         # (NL,)
    bt_col = np.concatenate([np.zeros((HALF_CH,), np.float32), np.asarray(p["bt"])])
    bc_time = np.tile(wl.sum(axis=1), B)                               # (NL,)
    h_bias = (bl_tiled[None, :] + bt_col[:, None]
              + np.asarray(p["bc"])[:, None] * bc_time[None, :])       # (IN_CH, NL)

    # Conv weights: conv1 fused [W0|W1|W2]; conv2 kept as three taps (split dots).
    w1f = np.concatenate([np.asarray(p["w1"][:, :, k]) for k in range(3)], axis=1)
    b1_plane = np.tile(np.asarray(p["b1"])[:, None], (1, NL))
    b2_plane = np.tile(np.asarray(p["b2"])[:, None], (1, NL))

    # 0/1 selection matrices (host-built once, never touched in the per-call path).
    E0 = np.zeros((NLX, NL), np.float32)
    E1 = np.zeros((NLX, NL), np.float32)
    for l in range(NLX):
        E0[l, 2 * l] = 1.0          # even output positions <- tap 0
        E1[l, 2 * l + 1] = 1.0      # odd  output positions <- tap 1
    Sp = np.zeros((NL, NL), np.float32)
    Sm = np.zeros((NL, NL), np.float32)
    for r in range(NL - 1):
        if (r + 1) % L_UP != 0:     # do not cross the batch seam (zero padding)
            Sp[r, r + 1] = 1.0
    for r in range(1, NL):
        if r % L_UP != 0:
            Sm[r, r - 1] = 1.0

    buf = np.zeros((P_ROWS, NL), np.float32)
    buf[OFF_E0:OFF_E0 + NLX, :] = E0
    buf[OFF_E1:OFF_E1 + NLX, :] = E1
    buf[OFF_SP:OFF_SP + NL, :] = Sp
    buf[OFF_SM:OFF_SM + NL, :] = Sm
    buf[OFF_WL:OFF_WL + NLL, :] = wl_big
    buf[OFF_HBIAS:OFF_HBIAS + IN_CH, :] = h_bias
    buf[OFF_WT:OFF_WT + 2 * IN_CH, 0:IN_CH] = wt_pad
    buf[OFF_WC:OFF_WC + IN_CH, 0:LSTM_CH] = wc
    buf[OFF_W1F:OFF_W1F + OUT_CH, 0:3 * IN_CH] = w1f
    buf[OFF_B1P:OFF_B1P + OUT_CH, :] = b1_plane
    for k, off in enumerate((OFF_W2K0, OFF_W2K1, OFF_W2K2)):
        buf[off:off + OUT_CH, 0:OUT_CH] = np.asarray(p["w2"][:, :, k])
    buf[OFF_B2P:OFF_B2P + OUT_CH, :] = b2_plane
    return jnp.asarray(buf)


# ---------------------------------- jitted forward ------------------------------------------
_VMEM = pl.BlockSpec(memory_space=pltpu.MemorySpace.VMEM)
# ~13 tiny f32 dots (~3.1e5 flop) and ~80 KiB of traffic -> hint XLA to schedule around it.
_COST = pl.CostEstimate(flops=320_000, transcendentals=0, bytes_accessed=80_000)


@jax.jit
def up_forward(x, down, lstm, packed):
    # diff = down.channels - transpose-out channels is 0 for a well-formed Up -> pad is a no-op.
    assert down.shape[1] == HALF_CH

    # Fold batch into the lane axis (layout plumbing; fused by XLA around the pallas_call).
    x_f = jnp.transpose(x, (1, 0, 2)).reshape(IN_CH, NLX)
    down_f = jnp.transpose(down, (1, 0, 2)).reshape(HALF_CH, NL)
    down_p = jnp.pad(down_f, ((0, IN_CH - HALF_CH), (0, 0)))       # zero rows for the "up" half
    lstm_f = jnp.transpose(lstm, (1, 0, 2)).reshape(LSTM_CH, NLL)

    out_f = pl.pallas_call(
        up_kernel,
        out_shape=jax.ShapeDtypeStruct((OUT_CH, NL), jnp.float32),
        in_specs=[_VMEM, _VMEM, _VMEM, _VMEM],
        out_specs=_VMEM,
        cost_estimate=_COST,
    )(x_f, down_p, lstm_f, packed)

    return jnp.transpose(out_f.reshape(OUT_CH, B, L_UP), (1, 0, 2))


# ---------------------------------- pure-JAX reference --------------------------------------
def up_reference(x, down, lstm, p):
    wc = p["wc"][:, :, 0]
    tmp = jnp.einsum("oc,bcl->bol", wc, lstm) + p["bc"][None, :, None]
    lstm_norm = jnp.einsum("bol,tl->bot", tmp, p["wl"]) + p["bl"][None, None, :]
    u0 = jnp.einsum("io,bil->bol", p["wt"][:, :, 0], x)
    u1 = jnp.einsum("io,bil->bol", p["wt"][:, :, 1], x)
    up = jnp.stack([u0, u1], axis=-1).reshape(B, HALF_CH, L_UP) + p["bt"][None, :, None]
    h = jnp.concatenate([down, up], axis=1) + lstm_norm

    def conv3(hin, w, b):
        hp = jnp.pad(hin, ((0, 0), (0, 0), (1, 1)))
        L = hin.shape[2]
        acc = sum(jnp.einsum("oi,bil->bol", w[:, :, k], hp[:, :, k:k + L]) for k in range(3))
        return acc + b[None, :, None]

    y = jax.nn.relu(conv3(h, p["w1"], p["b1"]))
    y = jax.nn.relu(conv3(y, p["w2"], p["b2"]))
    return y


# ---------------------------------- params / main -------------------------------------------
def init_params(key):
    ks = jax.random.split(key, 10)
    s = 0.1
    return {
        "wt": jax.random.normal(ks[0], (IN_CH, HALF_CH, 2), jnp.float32) * s,   # ConvTranspose1d
        "bt": jax.random.normal(ks[1], (HALF_CH,), jnp.float32) * s,
        "wc": jax.random.normal(ks[2], (IN_CH, LSTM_CH, 1), jnp.float32) * s,   # Glue1D channel matcher
        "bc": jax.random.normal(ks[3], (IN_CH,), jnp.float32) * s,
        "wl": jax.random.normal(ks[4], (L_UP, LSTM_L), jnp.float32) * s,        # Glue1D time matcher
        "bl": jax.random.normal(ks[5], (L_UP,), jnp.float32) * s,
        "w1": jax.random.normal(ks[6], (OUT_CH, IN_CH, 3), jnp.float32) * s,    # ConvBlock1D conv1
        "b1": jax.random.normal(ks[7], (OUT_CH,), jnp.float32) * s,
        "w2": jax.random.normal(ks[8], (OUT_CH, OUT_CH, 3), jnp.float32) * s,   # ConvBlock1D conv2
        "b2": jax.random.normal(ks[9], (OUT_CH,), jnp.float32) * s,
    }


if __name__ == "__main__":
    key = jax.random.PRNGKey(0)
    kx, kd, kl, kp = jax.random.split(key, 4)
    x = jax.random.normal(kx, (B, IN_CH, L_X), jnp.float32)
    down_output = jax.random.normal(kd, (B, HALF_CH, L_UP), jnp.float32)
    lstm_output = jax.random.normal(kl, (B, LSTM_CH, LSTM_L), jnp.float32)
    params = init_params(kp)

    # Built ONCE (model init), reused for every forward call -- not in the per-call path.
    packed = jax.block_until_ready(pack_params(params))

    out = jax.block_until_ready(up_forward(x, down_output, lstm_output, packed))

    ref = jax.block_until_ready(up_reference(x, down_output, lstm_output, params))
    np.testing.assert_allclose(np.asarray(out), np.asarray(ref), rtol=1e-4, atol=1e-4)
    print("KERNEL_OK")
</pallas_src>

<mosaic_0001>
module attributes {stable_mosaic.version = 11 : i64} {
  func.func @up_kernel(%arg0: memref<8x32xf32, #tpu.memory_space<vmem>>, %arg1: memref<8x64xf32, #tpu.memory_space<vmem>>, %arg2: memref<16x16xf32, #tpu.memory_space<vmem>>, %arg3: memref<288x64xf32, #tpu.memory_space<vmem>>, %arg4: memref<4x64xf32, #tpu.memory_space<vmem>>) attributes {dimension_semantics = [], scalar_prefetch = 0 : i64, scratch_operands = 0 : i64, tpu.core_type = #tpu.core_type<tc>} {
    %c0 = arith.constant 0 : index
    %c0_0 = arith.constant 0 : index
    %0 = vector.load %arg0[%c0, %c0_0] : memref<8x32xf32, #tpu.memory_space<vmem>>, vector<8x32xf32>
    %c0_1 = arith.constant 0 : index
    %c0_2 = arith.constant 0 : index
    %1 = vector.load %arg1[%c0_1, %c0_2] : memref<8x64xf32, #tpu.memory_space<vmem>>, vector<8x64xf32>
    %c0_3 = arith.constant 0 : index
    %c0_4 = arith.constant 0 : index
    %2 = vector.load %arg2[%c0_3, %c0_4] : memref<16x16xf32, #tpu.memory_space<vmem>>, vector<16x16xf32>
    %c232 = arith.constant 232 : index
    %c0_5 = arith.constant 0 : index
    %3 = vector.load %arg3[%c232, %c0_5] : memref<288x64xf32, #tpu.memory_space<vmem>>, vector<8x16xf32>
    %cst = arith.constant dense<0.000000e+00> : vector<8x16xf32>
    %4 = tpu.matmul %3, %2, %cst {dimension_numbers = #tpu.dot_dimension_numbers<[1], [0], [0], [1], [0, 0, 1, 1], [], []>} : vector<8x16xf32>, vector<16x16xf32>, vector<8x16xf32> -> vector<8x16xf32>
    %c192 = arith.constant 192 : index
    %c0_6 = arith.constant 0 : index
    %5 = vector.load %arg3[%c192, %c0_6] : memref<288x64xf32, #tpu.memory_space<vmem>>, vector<16x64xf32>
    %cst_7 = arith.constant dense<0.000000e+00> : vector<8x64xf32>
    %6 = tpu.matmul %4, %5, %cst_7 {dimension_numbers = #tpu.dot_dimension_numbers<[1], [0], [0], [1], [0, 0, 1, 1], [], []>} : vector<8x16xf32>, vector<16x64xf32>, vector<8x64xf32> -> vector<8x64xf32>
    %c216 = arith.constant 216 : index
    %c0_8 = arith.constant 0 : index
    %7 = vector.load %arg3[%c216, %c0_8] : memref<288x64xf32, #tpu.memory_space<vmem>>, vector<16x8xf32>
    %cst_9 = arith.constant dense<0.000000e+00> : vector<16x32xf32>
    %8 = tpu.matmul %7, %0, %cst_9 {dimension_numbers = #tpu.dot_dimension_numbers<[1], [0], [0], [1], [0, 0, 1, 1], [], []>} : vector<16x8xf32>, vector<8x32xf32>, vector<16x32xf32> -> vector<16x32xf32>
    %9 = vector.extract_strided_slice %8 {offsets = [0, 0], sizes = [8, 32], strides = [1, 1]} : vector<16x32xf32> to vector<8x32xf32>
    %c0_10 = arith.constant 0 : index
    %c0_11 = arith.constant 0 : index
    %10 = vector.load %arg3[%c0_10, %c0_11] : memref<288x64xf32, #tpu.memory_space<vmem>>, vector<32x64xf32>
    %cst_12 = arith.constant dense<0.000000e+00> : vector<8x64xf32>
    %11 = tpu.matmul %9, %10, %cst_12 {dimension_numbers = #tpu.dot_dimension_numbers<[1], [0], [0], [1], [0, 0, 1, 1], [], []>} : vector<8x32xf32>, vector<32x64xf32>, vector<8x64xf32> -> vector<8x64xf32>
    %12 = vector.extract_strided_slice %8 {offsets = [8, 0], sizes = [8, 32], strides = [1, 1]} : vector<16x32xf32> to vector<8x32xf32>
    %c32 = arith.constant 32 : index
    %c0_13 = arith.constant 0 : index
    %13 = vector.load %arg3[%c32, %c0_13] : memref<288x64xf32, #tpu.memory_space<vmem>>, vector<32x64xf32>
    %cst_14 = arith.constant dense<0.000000e+00> : vector<8x64xf32>
    %14 = tpu.matmul %12, %13, %cst_14 {dimension_numbers = #tpu.dot_dimension_numbers<[1], [0], [0], [1], [0, 0, 1, 1], [], []>} : vector<8x32xf32>, vector<32x64xf32>, vector<8x64xf32> -> vector<8x64xf32>
    %15 = arith.addf %11, %14 : vector<8x64xf32>
    %16 = arith.addf %1, %15 : vector<8x64xf32>
    %17 = arith.addf %16, %6 : vector<8x64xf32>
    %c208 = arith.constant 208 : index
    %c0_15 = arith.constant 0 : index
    %18 = vector.load %arg3[%c208, %c0_15] : memref<288x64xf32, #tpu.memory_space<vmem>>, vector<8x64xf32>
    %19 = arith.addf %17, %18 : vector<8x64xf32>
    %c64 = arith.constant 64 : index
    %c0_16 = arith.constant 0 : index
    %20 = vector.load %arg3[%c64, %c0_16] : memref<288x64xf32, #tpu.memory_space<vmem>>, vector<64x64xf32>
    %c128 = arith.constant 128 : index
    %c0_17 = arith.constant 0 : index
    %21 = vector.load %arg3[%c128, %c0_17] : memref<288x64xf32, #tpu.memory_space<vmem>>, vector<64x64xf32>
    %cst_18 = arith.constant dense<0.000000e+00> : vector<8x64xf32>
    %22 = tpu.matmul %19, %20, %cst_18 {dimension_numbers = #tpu.dot_dimension_numbers<[1], [0], [0], [1], [0, 0, 1, 1], [], []>} : vector<8x64xf32>, vector<64x64xf32>, vector<8x64xf32> -> vector<8x64xf32>
    %cst_19 = arith.constant dense<0.000000e+00> : vector<8x64xf32>
    %23 = tpu.matmul %19, %21, %cst_19 {dimension_numbers = #tpu.dot_dimension_numbers<[1], [0], [0], [1], [0, 0, 1, 1], [], []>} : vector<8x64xf32>, vector<64x64xf32>, vector<8x64xf32> -> vector<8x64xf32>
    %24 = tpu.concatenate %22, %19, %23 in 0 : vector<8x64xf32>, vector<8x64xf32>, vector<8x64xf32> -> vector<24x64xf32>
    %c240 = arith.constant 240 : index
    %c0_20 = arith.constant 0 : index
    %25 = vector.load %arg3[%c240, %c0_20] : memref<288x64xf32, #tpu.memory_space<vmem>>, vector<4x24xf32>
    %cst_21 = arith.constant dense<0.000000e+00> : vector<4x64xf32>
    %26 = tpu.matmul %25, %24, %cst_21 {dimension_numbers = #tpu.dot_dimension_numbers<[1], [0], [0], [1], [0, 0, 1, 1], [], []>} : vector<4x24xf32>, vector<24x64xf32>, vector<4x64xf32> -> vector<4x64xf32>
    %c248 = arith.constant 248 : index
    %c0_22 = arith.constant 0 : index
    %27 = vector.load %arg3[%c248, %c0_22] : memref<288x64xf32, #tpu.memory_space<vmem>>, vector<4x64xf32>
    %28 = arith.addf %26, %27 : vector<4x64xf32>
    %cst_23 = arith.constant 0.000000e+00 : f32
    %29 = vector.broadcast %cst_23 : f32 to vector<4x64xf32>
    %30 = arith.maximumf %28, %29 : vector<4x64xf32>
    %cst_24 = arith.constant dense<0.000000e+00> : vector<4x64xf32>
    %31 = tpu.matmul %30, %20, %cst_24 {dimension_numbers = #tpu.dot_dimension_numbers<[1], [0], [0], [1], [0, 0, 1, 1], [], []>} : vector<4x64xf32>, vector<64x64xf32>, vector<4x64xf32> -> vector<4x64xf32>
    %cst_25 = arith.constant dense<0.000000e+00> : vector<4x64xf32>
    %32 = tpu.matmul %30, %21, %cst_25 {dimension_numbers = #tpu.dot_dimension_numbers<[1], [0], [0], [1], [0, 0, 1, 1], [], []>} : vector<4x64xf32>, vector<64x64xf32>, vector<4x64xf32> -> vector<4x64xf32>
    %c256 = arith.constant 256 : index
    %c0_26 = arith.constant 0 : index
    %33 = vector.load %arg3[%c256, %c0_26] : memref<288x64xf32, #tpu.memory_space<vmem>>, vector<4x4xf32>
    %cst_27 = arith.constant dense<0.000000e+00> : vector<4x64xf32>
    %34 = tpu.matmul %33, %31, %cst_27 {dimension_numbers = #tpu.dot_dimension_numbers<[1], [0], [0], [1], [0, 0, 1, 1], [], []>} : vector<4x4xf32>, vector<4x64xf32>, vector<4x64xf32> -> vector<4x64xf32>
    %c264 = arith.constant 264 : index
    %c0_28 = arith.constant 0 : index
    %35 = vector.load %arg3[%c264, %c0_28] : memref<288x64xf32, #tpu.memory_space<vmem>>, vector<4x4xf32>
    %cst_29 = arith.constant dense<0.000000e+00> : vector<4x64xf32>
    %36 = tpu.matmul %35, %30, %cst_29 {dimension_numbers = #tpu.dot_dimension_numbers<[1], [0], [0], [1], [0, 0, 1, 1], [], []>} : vector<4x4xf32>, vector<4x64xf32>, vector<4x64xf32> -> vector<4x64xf32>
    %37 = arith.addf %34, %36 : vector<4x64xf32>
    %c272 = arith.constant 272 : index
    %c0_30 = arith.constant 0 : index
    %38 = vector.load %arg3[%c272, %c0_30] : memref<288x64xf32, #tpu.memory_space<vmem>>, vector<4x4xf32>
    %cst_31 = arith.constant dense<0.000000e+00> : vector<4x64xf32>
    %39 = tpu.matmul %38, %32, %cst_31 {dimension_numbers = #tpu.dot_dimension_numbers<[1], [0], [0], [1], [0, 0, 1, 1], [], []>} : vector<4x4xf32>, vector<4x64xf32>, vector<4x64xf32> -> vector<4x64xf32>
    %40 = arith.addf %37, %39 : vector<4x64xf32>
    %c280 = arith.constant 280 : index
    %c0_32 = arith.constant 0 : index
    %41 = vector.load %arg3[%c280, %c0_32] : memref<288x64xf32, #tpu.memory_space<vmem>>, vector<4x64xf32>
    %42 = arith.addf %40, %41 : vector<4x64xf32>
    %cst_33 = arith.constant 0.000000e+00 : f32
    %43 = vector.broadcast %cst_33 : f32 to vector<4x64xf32>
    %44 = arith.maximumf %42, %43 : vector<4x64xf32>
    %c0_34 = arith.constant 0 : index
    %c0_35 = arith.constant 0 : index
    %45 = vector.load %arg4[%c0_34, %c0_35] : memref<4x64xf32, #tpu.memory_space<vmem>>, vector<4x64xf32>
    tpu.vector_store %arg4[%c0_34, %c0_35], %44 {strides = array<i32>} : memref<4x64xf32, #tpu.memory_space<vmem>>, vector<4x64xf32>,
    return
  }
}

</mosaic_0001>

<bundles_post_ra>
// kernel: up_forward.1
= control target key start
LH: loop header
LB: loop body
LE: loop exit
PB: predicated region body
PF: predicated region fallthrough
CT: control target
= control target key end

     0   :  { %v1331_v0 = vmov 0.0|0.0   ;;  %vm1332_vm0 = vmmov 0   ;;  %v1333_v3 = vmov 0.0   ;;  %vm22_vm1 = vcmask 130048   ;;  %s1550_s2 = inlined_call_operand.vmem [shape: f32[16,16], index: 2, kind: input, shape index: {}]   ;;  %s1551_s0 = inlined_call_operand.vmem [shape: f32[8,32], index: 0, kind: input, shape index: {}]   ;;  %s1552_s3 = inlined_call_operand.vmem [shape: f32[288,64], index: 3, kind: input, shape index: {}]   ;;  %s1553_s1 = inlined_call_operand.vmem [shape: f32[8,64], index: 1, kind: input, shape index: {}]   ;;  %s1554_s4 = inlined_call_operand.vmem [shape: f32[4,64], index: 4, kind: output, shape index: {}]  }
   0x1   :  { %1259 = vmatprep.subr.bf16.mxu0 %v1331_v0  ;;  %v19_v1 = vld [vmem:[%s1550_s2] sm:$0xff]  ;;  %v20_v2 = vld [vmem:[%s1550_s2 + $0x8] sm:$0xff]  ;;  %1122 = vmatprep.mubr.msk.f32.mxu0 %vm1332_vm0, %v1333_v3  ;;  %v171_v10 = vld [vmem:[%s1552_s3 + $0xd8] sm:$0xff]  ;;  %vm173_vm2 = vcmask 64512   ;;  %vm263_vm3 = vcmask 261120   ;;  %vm430_vm4 = vcmask 523264  }
   0x2   :  { %v1260_v4 = vpack.c.bf16 %v20_v2, %v19_v1  ;;  %v17_v5 = vld [vmem:[%s1551_s0] sm:$0xff]  ;;  %1262 = vmatprep.subr.bf16.mxu1 %v1331_v0  ;;  %1129 = vmatprep.mubr.msk.f32.mxu1 %vm1332_vm0, %v1333_v3  ;;  %v97_v7 = vld [vmem:[%s1552_s3 + $0xc8] sm:$0xff]  ;;  %v257_v15 = vld [vmem:[%s1552_s3 + $0x10] sm:$0xff]  ;;  %vm576_vm5 = vcmask 195584   ;;  %vm800_vm6 = vcmask 1043456   ;;  %vm796_vm7 = vcmask 31744  }
   0x3   :  { %v96_v6 = vld [vmem:[%s1552_s3 + $0xc0] sm:$0xff]  ;;  %v21_v8 = vld [vmem:[%s1552_s3 + $0xe8] sm:$0xff]  ;;  %v258_v16 = vld [vmem:[%s1552_s3 + $0x18] sm:$0xff]  ;;  %vm1030_vm8 = vcmask 519168  }
   0x4   :  { %1261 = vmatpush3.bf16.msra.mxu0 %v1260_v4  ;;  %v1263_v9 = vpack.c.bf16 %v97_v7, %v96_v6  ;;  %v255_v11 = vld [vmem:[%s1552_s3] sm:$0xff]  ;;  %v256_v12 = vld [vmem:[%s1552_s3 + $0x8] sm:$0xff]  ;;  %v1275_v17 = vpack.c.bf16 %v258_v16, %v257_v15  ;;  %v261_v21 = vld [vmem:[%s1552_s3 + $0x30] sm:$0xff] }
   0x5   :  { %1132 = vmatprep.subr.mxu0 %v17_v5  ;;  %v172_v13 = vld [vmem:[%s1552_s3 + $0xe0] sm:$0xff]  ;;  %v1272_v14 = vpack.c.bf16 %v256_v12, %v255_v11  ;;  %v260_v19 = vld [vmem:[%s1552_s3 + $0x28] sm:$0xff]  ;;  %v262_v22 = vld [vmem:[%s1552_s3 + $0x38] sm:$0xff] }
   0x6   :  { %1264 = vmatpush3.bf16.msra.mxu1 %v1263_v9  ;;  %v259_v18 = vld [vmem:[%s1552_s3 + $0x20] sm:$0xff]  ;;  %v1269_v25 = vpack.c.bf16 %v262_v22, %v261_v21  ;;  %v415_v29 = vld [vmem:[%s1552_s3 + $0x48] sm:$0xff]  ;;  %v416_v34 = vld [vmem:[%s1552_s3 + $0x50] sm:$0xff] }
   0x7   :  { %1123 = vmatmul.mubr.msk.f32.vlgmr.msra.gmra.mrb[0].mxu0 %vm22_vm1, %v21_v8  ;;  %1265 = vmatprep.subr.bf16.mxu1 %v1331_v0  ;;  %v1266_v20 = vpack.c.bf16 %v260_v19, %v259_v18  ;;  %v414_v28 = vld [vmem:[%s1552_s3 + $0x40] sm:$0xff]  ;;  %v423_v32 = vld [vmem:[%s1552_s3 + $0x88] sm:$0xff]  ;;  %v417_v35 = vld [vmem:[%s1552_s3 + $0x58] sm:$0xff] }
   0x8   :  { %1133 = vmatpush3.msra.mxu0 %v17_v5  ;;  %1134 = vmatprep.mubr.msk.f32.mxu0 %vm173_vm2, %v171_v10  ;;  %v422_v30 = vld [vmem:[%s1552_s3 + $0x80] sm:$0xff]  ;;  %v1278_v31 = vpack.c.bf16 %v415_v29, %v414_v28  ;;  %v424_v36 = vld [vmem:[%s1552_s3 + $0x90] sm:$0xff]  ;;  %v1281_v37 = vpack.c.bf16 %v417_v35, %v416_v34  ;;  %v425_v38 = vld [vmem:[%s1552_s3 + $0x98] sm:$0xff] }
   0x9   :  { %1271 = vmatprep.subr.bf16.mxu0 %v1331_v0  ;;  %v1441_v33 = vpack.c.bf16 %v423_v32, %v422_v30  ;;  %v1458_v39 = vpack.c.bf16 %v425_v38, %v424_v36  ;;  %v418_v40 = vld [vmem:[%s1552_s3 + $0x60] sm:$0xff]  ;;  %v419_v41 = vld [vmem:[%s1552_s3 + $0x68] sm:$0xff]  ;;  %v420_v46 = vld [vmem:[%s1552_s3 + $0x70] sm:$0xff] }
   0xa   :  { %v1284_v42 = vpack.c.bf16 %v419_v41, %v418_v40  ;;  %v426_v43 = vld [vmem:[%s1552_s3 + $0xa0] sm:$0xff]  ;;  %v427_v44 = vld [vmem:[%s1552_s3 + $0xa8] sm:$0xff]  ;;  %v421_v47 = vld [vmem:[%s1552_s3 + $0x78] sm:$0xff] }
   0xb   :  { %1135 = vmatmul.mubr.msk.f32.vlgmr.msra.gmra.mrb[2].mxu0 %vm173_vm2, %v172_v13  ;;  %v1296_v45 = vpack.c.bf16 %v427_v44, %v426_v43  ;;  %v428_v48 = vld [vmem:[%s1552_s3 + $0xb0] sm:$0xff]  ;;  %v1287_v49 = vpack.c.bf16 %v421_v47, %v420_v46  ;;  %v429_v50 = vld [vmem:[%s1552_s3 + $0xb8] sm:$0xff]  ;;  %v18_v56 = vld [vmem:[%s1553_s1] sm:$0xff] }
   0xc   :  { %1273 = vmatpush3.bf16.msra.mxu0 %v1272_v14  ;;  %1156 = vmatprep.mubr.msk.f32.mxu0 %vm1332_vm0, %v1333_v3  ;;  %v1299_v51 = vpack.c.bf16 %v429_v50, %v428_v48  ;;  %v412_v61 = vld [vmem:[%s1552_s3 + $0xd0] sm:$0xff]  ;;  %v575_v8 = vld [vmem:[%s1552_s3 + $0xf8] sm:$0xf]  ;;  %v794_v13 = vld [vmem:[%s1552_s3 + $0x100] sm:$0xf] }
   0xd   :  { %1274 = vmatprep.subr.bf16.mxu0 %v1331_v0  ;;  %v574_v7 = vld [vmem:[%s1552_s3 + $0xf0] sm:$0xf] }
   0xe   :  { %v949_v14 = vld [vmem:[%s1552_s3 + $0x110] sm:$0xf] }
  0x10   :  { %1276 = vmatpush3.bf16.msra.mxu0 %v1275_v17 }
  0x11   :  { %1289 = vmatprep.subr.bf16.mxu0 %v1331_v0 }
  0xda   :  { %v92_v23 = vpop.f32.mrb[0].mxu0 }
  0xdb   :  { %v1124_v24 = vpop.f32.mrb[1].mxu0  ;;  %1130 = vmatmul.mubr.msk.f32.vlgmr.msra.gmra.mrb[0].mxu1 %vm22_vm1, %v92_v23 }
  0xdc   :  { %1267 = vmatpush3.bf16.msra.mxu1 %v1266_v20  ;;  %1145 = vmatprep.mubr.msk.f32.mxu1 %vm1332_vm0, %v1333_v3 }
  0xdd   :  { %1268 = vmatprep.subr.bf16.mxu1 %v1331_v0 }
  0xde   :  { %v1136_v26 = vpop.f32.mrb[2].mxu0 }
  0xdf   :  { %v246_v27 = vpop.f32.mrb[3].mxu0 }
  0xe0   :  { %1270 = vmatpush3.bf16.msra.mxu1 %v1269_v25  ;;  %1157 = vmatmul.mubr.msk.f32.vlgmr.msra.gmra.mrb[4].mxu0 %vm263_vm3, %v246_v27  ;;  %v1027_v25 = vld [vmem:[%s1552_s3 + $0x118] sm:$0xf] }
  0xe1   :  { %1277 = vmatprep.subr.bf16.mxu1 %v1331_v0  ;;  %1194 = vmatprep.mubr.msk.f32.mxu0 %vm1332_vm0, %v1333_v3 }
  0xe2   :  { %1291 = vmatpush3.bf16.msra.mxu0 %v1441_v33 }
  0xe3   :  { %1146 = vmatmul.mubr.msk.f32.vlgmr.msra.gmra.mrb[2].mxu1 %vm263_vm3, %v1136_v26  ;;  %1292 = vmatprep.subr.bf16.mxu0 %v1331_v0 }
  0xe4   :  { %1175 = vmatprep.mubr.msk.f32.mxu1 %vm1332_vm0, %v1333_v3  ;;  %1279 = vmatpush3.bf16.msra.mxu1 %v1278_v31 }
  0xe5   :  { %1280 = vmatprep.subr.bf16.mxu1 %v1331_v0 }
  0xe6   :  { %1294 = vmatpush3.bf16.msra.mxu0 %v1458_v39 }
  0xe7   :  { %1295 = vmatprep.subr.bf16.mxu0 %v1331_v0 }
  0xe8   :  { %1282 = vmatpush3.bf16.msra.mxu1 %v1281_v37 }
  0xe9   :  { %1283 = vmatprep.subr.bf16.mxu1 %v1331_v0 }
  0xea   :  { %1297 = vmatpush3.bf16.msra.mxu0 %v1296_v45 }
  0xeb   :  { %1298 = vmatprep.subr.bf16.mxu0 %v1331_v0 }
  0xec   :  { %1285 = vmatpush3.bf16.msra.mxu1 %v1284_v42 }
  0xed   :  { %1286 = vmatprep.subr.bf16.mxu1 %v1331_v0 }
  0xee   :  { %1300 = vmatpush3.bf16.msra.mxu0 %v1299_v51 }
  0xef   :  { %1304 = vmatprep.subr.bf16.mxu0 %v1331_v0 }
  0xf0   :  { %1288 = vmatpush3.bf16.msra.mxu1 %v1287_v49 }
  0xf1   :  { %1301 = vmatprep.subr.bf16.mxu1 %v1331_v0 }
 0x1ae   :  { %v167_v52 = vpop.f32.mrb[0].mxu1 }
 0x1af   :  { %v1131_v53 = vpop.f32.mrb[1].mxu1 }
 0x1b3   :  { %v406_v54 = vpop.f32.mrb[4].mxu0 }
 0x1b4   :  { %v1158_v55 = vpop.f32.mrb[5].mxu0 }
 0x1b6   :  { %v333_v57 = vpop.f32.mrb[2].mxu1 }
 0x1b7   :  { %v407_v58 = vadd.f32 %v406_v54, %v333_v57  ;;  %v1147_v59 = vpop.f32.mrb[3].mxu1 }
 0x1b9   :  { %v410_v60 = vadd.f32 %v407_v58, %v18_v56 }
 0x1bb   :  { %v411_v62 = vadd.f32 %v410_v60, %v167_v52 }
 0x1bd   :  { %v413_v63 = vadd.f32 %v412_v61, %v411_v62 }
 0x1bf   :  { %1176 = vmatmul.mubr.msk.f32.vlgmr.msra.gmra.mrb[4].mxu1 %vm430_vm4, %v413_v63  ;;  %1195 = vmatmul.mubr.msk.f32.vlgmr.msra.gmra.mrb[6].mxu0 %vm430_vm4, %v413_v63 }
 0x1c0   :  { %1203 = vmatprep.mubr.msk.f32.mxu1 %vm1332_vm0, %v1333_v3  ;;  %1306 = vmatpush3.bf16.msra.mxu0 %v1278_v31 }
 0x1c1   :  { %1307 = vmatprep.subr.bf16.mxu0 %v1331_v0  ;;  %1222 = vmatprep.mubr.msk.f32.mxu0 %vm1332_vm0, %v1333_v3 }
 0x1c4   :  { %1309 = vmatpush3.bf16.msra.mxu0 %v1281_v37 }
 0x1c5   :  { %1310 = vmatprep.subr.bf16.mxu0 %v1331_v0 }
 0x1c8   :  { %1312 = vmatpush3.bf16.msra.mxu0 %v1284_v42 }
 0x1c9   :  { %1313 = vmatprep.subr.bf16.mxu0 %v1331_v0 }
 0x1cc   :  { %1315 = vmatpush3.bf16.msra.mxu0 %v1287_v49 }
 0x1cd   :  { %1244 = vmatprep.subr.mxu0 %v1333_v3 }
 0x292   :  { %v500_v1 = vpop.f32.mrb[4].mxu1  ;;  %v570_v2 = vpop.f32.mrb[6].mxu0 }
 0x293   :  { %v1302_v4 = vpack.c.bf16 %v413_v63, %v500_v1  ;;  %v1177_v5 = vpop.f32.mrb[5].mxu1  ;;  %v1196_v6 = vpop.f32.mrb[7].mxu0 }
 0x295   :  { %1303 = vmatpush3.bf16.msra.mxu1 %v1302_v4 }
 0x296   :  { %1201 = vmatprep.subr.mxu1 %v1333_v3 }
 0x299   :  { %1202 = vmatpush3.msra.mxu1 %v570_v2 }
 0x29a   :  { %1204 = vmatmul.mubr.msk.f32.vlgmr.msra.gmra.mrb[6].mxu1 %vm576_vm5, %v574_v7  ;;  %1316 = vmatprep.subr.bf16.mxu1 %v1331_v0 }
 0x29b   :  { %1318 = vmatpush3.bf16.msra.mxu1 %v1441_v33  ;;  %1241 = vmatprep.mubr.msk.f32.mxu1 %vm1332_vm0, %v1333_v3 }
 0x29c   :  { %1319 = vmatprep.subr.bf16.mxu1 %v1331_v0 }
 0x29f   :  { %1321 = vmatpush3.bf16.msra.mxu1 %v1458_v39 }
 0x2a0   :  { %1322 = vmatprep.subr.bf16.mxu1 %v1331_v0 }
 0x2a3   :  { %1324 = vmatpush3.bf16.msra.mxu1 %v1296_v45 }
 0x2a4   :  { %1325 = vmatprep.subr.bf16.mxu1 %v1331_v0  ;;  %v795_v0 = vld [vmem:[%s1552_s3 + $0x108] sm:$0xf] }
 0x2a7   :  { %1327 = vmatpush3.bf16.msra.mxu1 %v1299_v51 }
 0x2a8   :  { %1249 = vmatprep.subr.mxu1 %v1333_v3 }
 0x36d   :  { %v646_v9 = vpop.f32.mrb[6].mxu1 }
 0x36e   :  { %v647_v10 = vadd.f32 %v646_v9, %v575_v8  ;;  %v1205_v11 = vpop.f32.mrb[7].mxu1 }
 0x370   :  { %v650_v12 = vmax.f32 %v647_v10, 0.0 }
 0x372   :  { %1223 = vmatmul.mubr.msk.f32.vlgmr.msra.gmra.mrb[8].mxu0 %vm430_vm4, %v650_v12  ;;  %1242 = vmatmul.mubr.msk.f32.vlgmr.msra.gmra.mrb[8].mxu1 %vm430_vm4, %v650_v12 }
 0x373   :  { %1245 = vmatpush3.msk.msra.mxu0 %vm800_vm6, %v650_v12  ;;  %1246 = vmatprep.mubr.msk.f32.mxu0 %vm1332_vm0, %v1333_v3 }
 0x374   :  { %1254 = vmatprep.subr.mxu0 %v1333_v3  ;;  %1251 = vmatprep.mubr.msk.f32.mxu1 %vm1332_vm0, %v1333_v3 }
 0x376   :  { %1247 = vmatmul.mubr.msk.f32.vlgmr.msra.gmra.mrb[10].mxu0 %vm796_vm7, %v795_v0 }
 0x377   :  { %1256 = vmatprep.mubr.msk.f32.mxu0 %vm1332_vm0, %v1333_v3 }
 0x445   :  { %v720_v15 = vpop.f32.mrb[8].mxu0  ;;  %v790_v16 = vpop.f32.mrb[8].mxu1 }
 0x446   :  { %v1224_v17 = vpop.f32.mrb[9].mxu0  ;;  %v1243_v18 = vpop.f32.mrb[9].mxu1  ;;  %1250 = vmatpush3.msk.msra.mxu1 %vm800_vm6, %v720_v15  ;;  %1255 = vmatpush3.msk.msra.mxu0 %vm800_vm6, %v790_v16 }
 0x447   :  { %1252 = vmatmul.mubr.msk.f32.vlgmr.msra.gmra.mrb[10].mxu1 %vm796_vm7, %v794_v13  ;;  %1257 = vmatmul.mubr.msk.f32.vlgmr.msra.gmra.mrb[12].mxu0 %vm796_vm7, %v949_v14 }
 0x449   :  { %v869_v19 = vpop.f32.mrb[10].mxu0 }
 0x44a   :  { %v1248_v3 = vpop.f32.mrb[11].mxu0 }
 0x51a   :  { %v945_v20 = vpop.f32.mrb[10].mxu1  ;;  %v1022_v21 = vpop.f32.mrb[12].mxu0 }
 0x51b   :  { %v946_v22 = vadd.f32 %v945_v20, %v869_v19  ;;  %v1253_v23 = vpop.f32.mrb[11].mxu1  ;;  %v1258_v24 = vpop.f32.mrb[13].mxu0 }
 0x51d   :  { %v1026_v26 = vadd.f32 %v1022_v21, %v946_v22 }
 0x51f   :  { %v1028_v27 = vadd.f32 %v1027_v25, %v1026_v26 }
 0x521   :  { %v1029_v28 = vmax.f32 %v1028_v27, 0.0 }
 0x523   :  { %1031 = vst.msk [vmem:[%s1554_s4] sm:$0xf] %vm1030_vm8, %v1029_v28 }

</bundles_post_ra>
